<compile_context>
chip_gen: v6e
topology: v6e:2x2x1
jax: 0.10.0
libtpu: 0.0.40
codegen_flags: <defaults>
</compile_context>

<pallas_src>
import math

import jax
import jax.numpy as jnp
import numpy as np
from jax.experimental import pallas as pl
from jax.experimental.pallas import tpu as pltpu

# ------------------------- synthetic config -------------------------
BATCH = 8
CONTINUOUS_DIM = 4          # config.data.continuos_dimensions
TIME_EMBED_DIM = 8          # config.continuous_network.time_embed_dim
DISCRETE_EMBED_DIM = 8      # config.continuous_network.discrete_embed_dim
VOCAB_SIZE = 10             # config.data.vocab_size
HIDDEN = 32                 # config.continuous_network.hidden_dim
NUM_LAYERS = 3              # config.continuous_network.num_layers
BN_EPS = 1e-5
MAX_PERIOD = 10000.0
HALF = TIME_EMBED_DIM // 2
D_IN = CONTINUOUS_DIM + DISCRETE_EMBED_DIM + TIME_EMBED_DIM
# activation: get_activation_function(config.continuous_network.activation) -> ReLU here.

# ------------------------- packed layouts (static) -------------------------
LANE = 128                      # lane-dense feature padding
VOCAB_PAD = 16                  # one-hot width (>= VOCAB_SIZE)

# Fused layer-0 input tile U = [x | onehot | cos | sin | pad] and matching W0 block rows.
C_X = 0
C_OH = C_X + CONTINUOUS_DIM                 # 4
C_COS = C_OH + VOCAB_PAD                    # 20
C_SIN = C_COS + HALF                        # 24
K0 = C_SIN + HALF                           # 28
K0_PAD = 32                                 # pad to a 16-row bf16 tile multiple

# bf16 weight slab rows (all block starts are multiples of 16 -> no relayouts on slicing).
R_W0 = 0                                    # fused layer-0 block (K0_PAD rows)
R_WH = R_W0 + K0_PAD                        # hidden weights, LANE rows each (K zero-padded)
R_WOUT = R_WH + (NUM_LAYERS - 1) * LANE     # head weight, LANE rows (K zero-padded)
N_WROWS = R_WOUT + LANE                     # 416

# f32 vector slab rows.
R_GAMMA = 0
R_BETA = R_GAMMA + NUM_LAYERS
R_BOUT = R_BETA + NUM_LAYERS                # head bias (first CONTINUOUS_DIM lanes)
R_FREQ = R_BOUT + 1                         # sinusoidal frequencies (first HALF lanes)
N_VROWS = 8

# packed activation input columns: [x_cont | time | id | pad]
IN_COLS = 8
COL_T = CONTINUOUS_DIM                      # 4
COL_ID = COL_T + 1                          # 5


# ------------------------- Pallas kernel -------------------------
def deep_mlp_kernel(in_ref, w_ref, v_ref, o_ref):
    bf16 = jnp.bfloat16
    f32 = jnp.float32
    B = in_ref.shape[0]

    xin = in_ref[...]                                        # (B, IN_COLS) f32
    x = xin[:, :CONTINUOUS_DIM]                              # (B, C)
    t = xin[:, COL_T:COL_T + 1]                              # (B, 1)
    ids_i = xin[:, COL_ID:COL_ID + 1].astype(jnp.int32)      # (B, 1), small exact ints

    # --- sinusoidal time embedding: freqs precomputed in the vector slab (EUP cos/sin only) ---
    freqs = v_ref[R_FREQ:R_FREQ + 1, :HALF]                  # (1, HALF) f32
    args = t * freqs                                         # (B, HALF)
    cos_e = jnp.cos(args).astype(bf16)
    sin_e = jnp.sin(args).astype(bf16)

    # --- discrete-context lookup: one-hot directly in bf16 (embedding folded into W0) ---
    onehot = (jax.lax.broadcasted_iota(jnp.int32, (B, VOCAB_PAD), 1) == ids_i).astype(bf16)

    # --- fused layer-0 input tile [x | onehot | cos | sin | pad] -> ONE MXU push ---
    u = jnp.concatenate(
        [x.astype(bf16), onehot, cos_e, sin_e, jnp.zeros((B, K0_PAD - K0), bf16)],
        axis=1)                                              # (B, K0_PAD)

    def bn_relu(z, idx):
        # nn.BatchNorm1d forward, training-mode batch statistics, two-pass variance,
        # fused into a single scale/shift, then ReLU. Padded lanes have gamma=beta=0
        # so they stay exactly zero.
        gamma = v_ref[R_GAMMA + idx:R_GAMMA + idx + 1, :]    # (1, LANE)
        beta = v_ref[R_BETA + idx:R_BETA + idx + 1, :]       # (1, LANE)
        mean = jnp.mean(z, axis=0, keepdims=True)
        d = z - mean
        var = jnp.mean(d * d, axis=0, keepdims=True)
        scale = gamma * jax.lax.rsqrt(var + BN_EPS)
        return jnp.maximum(d * scale + beta, 0.0)

    # --- layer 0: single matmul against the contiguous fused W0 block (embedding folded in).
    #     Linear biases feeding a training-mode BatchNorm cancel exactly -> dropped.
    z = jnp.dot(u, w_ref[R_W0:R_W0 + K0_PAD, :], preferred_element_type=f32)   # (B, LANE)
    h = bn_relu(z, 0)

    # --- hidden layers: Linear(H->H) + BN + ReLU; K zero-padded to LANE ---
    # TODO(synk): experiment with 32-row / 32-lane hidden tiles (review item 7) once the
    # lowering is confirmed relayout-free; kept lane-padded 128x128 here for safety.
    for l in range(NUM_LAYERS - 1):
        z = jnp.dot(h.astype(bf16), w_ref[R_WH + l * LANE:R_WH + (l + 1) * LANE, :],
                    preferred_element_type=f32)
        h = bn_relu(z, l + 1)

    # --- continuous_head: Linear(H -> continuous_dim) (bias kept: no BN after it) ---
    out = jnp.dot(h.astype(bf16), w_ref[R_WOUT:R_WOUT + LANE, :], preferred_element_type=f32)
    o_ref[...] = out[:, :CONTINUOUS_DIM] + v_ref[R_BOUT:R_BOUT + 1, :CONTINUOUS_DIM]


def _vmem_spec():
    return pl.BlockSpec(memory_space=pltpu.MemorySpace.VMEM)


def deep_mlp_forward(packed_in, wslab, vslab):
    b = packed_in.shape[0]
    return pl.pallas_call(
        deep_mlp_kernel,
        out_shape=jax.ShapeDtypeStruct((b, CONTINUOUS_DIM), jnp.float32),
        in_specs=[_vmem_spec() for _ in range(3)],
        out_specs=_vmem_spec(),
    )(packed_in, wslab, vslab)


@jax.jit
def deep_mlp_apply(wslab, vslab, x_continuous, times, context_discrete):
    # forward() glue: reshapes + packing the three tiny inputs into one DMA.
    b = x_continuous.shape[0]
    t = jnp.reshape(times, (b, 1)).astype(jnp.float32)
    ids = jnp.reshape(context_discrete, (b, 1)).astype(jnp.float32)   # exact for small ints
    packed = jnp.concatenate(
        [x_continuous.astype(jnp.float32), t, ids,
         jnp.zeros((b, IN_COLS - CONTINUOUS_DIM - 2), jnp.float32)], axis=1)
    return deep_mlp_forward(packed, wslab, vslab)


# ------------------------- parameter init & packing (one-time, off hot path) ------------
def xavier_uniform(key, fan_in, fan_out):
    bound = math.sqrt(6.0 / (fan_in + fan_out))
    return jax.random.uniform(key, (fan_in, fan_out), jnp.float32, -bound, bound)


def init_params(key):
    ks = jax.random.split(key, 16)
    params = {}
    # nn.Embedding(vocab_size, discrete_embed_dim): default N(0,1) init
    params["embed"] = jax.random.normal(ks[0], (VOCAB_SIZE, DISCRETE_EMBED_DIM), jnp.float32)
    # Linear 0 (xavier_uniform weight per init_weights; bias default uniform)
    params["w0"] = xavier_uniform(ks[1], D_IN, HIDDEN)
    b_bound = 1.0 / math.sqrt(D_IN)
    params["b0"] = jax.random.uniform(ks[2], (1, HIDDEN), jnp.float32, -b_bound, b_bound)
    wh, bh = [], []
    for l in range(NUM_LAYERS - 1):
        wh.append(xavier_uniform(ks[3 + l], HIDDEN, HIDDEN))
        hb = 1.0 / math.sqrt(HIDDEN)
        bh.append(jax.random.uniform(ks[8 + l], (HIDDEN,), jnp.float32, -hb, hb))
    params["wh"] = jnp.stack(wh, axis=0)               # (L-1, H, H)
    params["bh"] = jnp.stack(bh, axis=0)               # (L-1, H)
    # BatchNorm1d affine params (default gamma=1, beta=0)
    params["gamma"] = jnp.ones((NUM_LAYERS, HIDDEN), jnp.float32)
    params["beta"] = jnp.zeros((NUM_LAYERS, HIDDEN), jnp.float32)
    # continuous_head (default PyTorch Linear init)
    wb = 1.0 / math.sqrt(HIDDEN)
    params["wout"] = jax.random.uniform(ks[12], (HIDDEN, CONTINUOUS_DIM), jnp.float32, -wb, wb)
    params["bout"] = jax.random.uniform(ks[13], (1, CONTINUOUS_DIM), jnp.float32, -wb, wb)
    return params


def pack_params(params):
    """Pack parameters into a bf16 weight slab + f32 vector slab (3 input DMAs per call).

    * The embedding table is folded into W0's context segment: E @ W0_ctx (VOCAB x HIDDEN),
      so the in-kernel one-hot multiplies it directly (no separate embedding matmul).
    * Linear biases b0/bh are intentionally not packed: they sit in front of a
      training-mode BatchNorm whose batch-mean subtraction cancels them exactly.
    * gamma/beta/head-bias/freqs stay f32 (precision), weights go bf16 (MXU inputs).
    """
    c, e = CONTINUOUS_DIM, DISCRETE_EMBED_DIM
    w0 = params["w0"]                                         # (D_IN, HIDDEN), rows: [x|ctx|cos|sin]
    w0_ctx_folded = params["embed"] @ w0[c:c + e]             # (VOCAB_SIZE, HIDDEN)

    w = jnp.zeros((N_WROWS, LANE), jnp.float32)
    w = w.at[R_W0 + C_X:R_W0 + C_X + c, :HIDDEN].set(w0[:c])
    w = w.at[R_W0 + C_OH:R_W0 + C_OH + VOCAB_SIZE, :HIDDEN].set(w0_ctx_folded)
    w = w.at[R_W0 + C_COS:R_W0 + C_COS + HALF, :HIDDEN].set(w0[c + e:c + e + HALF])
    w = w.at[R_W0 + C_SIN:R_W0 + C_SIN + HALF, :HIDDEN].set(w0[c + e + HALF:])
    for l in range(NUM_LAYERS - 1):
        w = w.at[R_WH + l * LANE:R_WH + l * LANE + HIDDEN, :HIDDEN].set(params["wh"][l])
    w = w.at[R_WOUT:R_WOUT + HIDDEN, :CONTINUOUS_DIM].set(params["wout"])
    wslab = w.astype(jnp.bfloat16)

    v = jnp.zeros((N_VROWS, LANE), jnp.float32)
    v = v.at[R_GAMMA:R_GAMMA + NUM_LAYERS, :HIDDEN].set(params["gamma"])
    v = v.at[R_BETA:R_BETA + NUM_LAYERS, :HIDDEN].set(params["beta"])
    v = v.at[R_BOUT, :CONTINUOUS_DIM].set(params["bout"].reshape(-1))
    freqs = np.exp(-math.log(MAX_PERIOD) * np.arange(HALF, dtype=np.float32) / HALF)
    v = v.at[R_FREQ, :HALF].set(jnp.asarray(freqs))
    return wslab, v


# ------------------------- pure-JAX references -------------------------
def deep_mlp_mirror(wslab, vslab, x_continuous, times, context_discrete):
    """Pure-JAX replay of the kernel math on the packed slabs (tight numeric mirror)."""
    bf16 = jnp.bfloat16
    b = x_continuous.shape[0]
    t = times.reshape(b, 1).astype(jnp.float32)
    ids = context_discrete.reshape(b, 1).astype(jnp.int32)
    freqs = vslab[R_FREQ:R_FREQ + 1, :HALF]
    args = t * freqs
    onehot = (jnp.arange(VOCAB_PAD)[None, :] == ids).astype(bf16)
    u = jnp.concatenate([x_continuous.astype(bf16), onehot,
                         jnp.cos(args).astype(bf16), jnp.sin(args).astype(bf16),
                         jnp.zeros((b, K0_PAD - K0), bf16)], axis=1)

    def bn_relu(z, idx):
        gamma = vslab[R_GAMMA + idx:R_GAMMA + idx + 1, :]
        beta = vslab[R_BETA + idx:R_BETA + idx + 1, :]
        m = jnp.mean(z, axis=0, keepdims=True)
        d = z - m
        var = jnp.mean(d * d, axis=0, keepdims=True)
        return jnp.maximum(d * gamma * jax.lax.rsqrt(var + BN_EPS) + beta, 0.0)

    z = jnp.dot(u, wslab[R_W0:R_W0 + K0_PAD], preferred_element_type=jnp.float32)
    h = bn_relu(z, 0)
    for l in range(NUM_LAYERS - 1):
        z = jnp.dot(h.astype(bf16), wslab[R_WH + l * LANE:R_WH + (l + 1) * LANE],
                    preferred_element_type=jnp.float32)
        h = bn_relu(z, l + 1)
    out = jnp.dot(h.astype(bf16), wslab[R_WOUT:R_WOUT + LANE],
                  preferred_element_type=jnp.float32)
    return out[:, :CONTINUOUS_DIM] + vslab[R_BOUT:R_BOUT + 1, :CONTINUOUS_DIM]


def sinusoidal_timestep_embedding(times, dim, max_period=MAX_PERIOD):
    half = dim // 2
    freqs = jnp.exp(-math.log(max_period) * jnp.arange(half, dtype=jnp.float32) / half)
    args = times.astype(jnp.float32)[:, None] * freqs[None, :]
    emb = jnp.concatenate([jnp.cos(args), jnp.sin(args)], axis=-1)
    if dim % 2:
        emb = jnp.concatenate([emb, jnp.zeros_like(emb[:, :1])], axis=-1)
    return emb


def deep_mlp_reference_f32(params, x_continuous, times, context_discrete):
    """Exact f32 torch-module semantics (training-mode BN, biases included)."""
    times = times.reshape(-1)
    ctx = params["embed"][context_discrete.reshape(-1).astype(jnp.int32)]   # (B, E)
    t = sinusoidal_timestep_embedding(times, TIME_EMBED_DIM)
    x = jnp.concatenate([x_continuous, ctx, t], axis=1)

    def bn(z, g, b):
        m = jnp.mean(z, axis=0, keepdims=True)
        v = jnp.mean((z - m) ** 2, axis=0, keepdims=True)
        return (z - m) / jnp.sqrt(v + BN_EPS) * g + b

    h = jnp.maximum(bn(x @ params["w0"] + params["b0"],
                       params["gamma"][0], params["beta"][0]), 0.0)
    for l in range(NUM_LAYERS - 1):
        h = jnp.maximum(bn(h @ params["wh"][l] + params["bh"][l],
                           params["gamma"][l + 1], params["beta"][l + 1]), 0.0)
    return h @ params["wout"] + params["bout"]


if __name__ == "__main__":
    key = jax.random.PRNGKey(0)
    kp, kx, kt, kc = jax.random.split(key, 4)
    params = init_params(kp)
    wslab, vslab = pack_params(params)          # one-time packing, off the hot path

    x_continuous = jax.random.normal(kx, (BATCH, CONTINUOUS_DIM), jnp.float32)
    times = jax.random.uniform(kt, (BATCH, 1), jnp.float32)
    context_discrete = jax.random.randint(kc, (BATCH, 1), 0, VOCAB_SIZE)

    out = deep_mlp_apply(wslab, vslab, x_continuous, times, context_discrete)
    out = jax.block_until_ready(out)
    assert out.shape == (BATCH, CONTINUOUS_DIM)

    # Tight check vs. a pure-JAX mirror of the kernel numerics (packed bf16 slabs).
    ref_mirror = deep_mlp_mirror(wslab, vslab, x_continuous, times, context_discrete)
    np.testing.assert_allclose(np.asarray(out), np.asarray(ref_mirror),
                               rtol=5e-3, atol=5e-3)

    # Looser check vs. exact f32 torch-module semantics (gap is bf16 weight/input rounding).
    ref_f32 = deep_mlp_reference_f32(params, x_continuous, times, context_discrete)
    np.testing.assert_allclose(np.asarray(out), np.asarray(ref_f32),
                               rtol=5e-2, atol=5e-2)

    print("KERNEL_OK")
</pallas_src>

<mosaic_0001>
module attributes {stable_mosaic.version = 11 : i64} {
  func.func @deep_mlp_kernel(%arg0: memref<8x8xf32, #tpu.memory_space<vmem>>, %arg1: memref<416x128xbf16, #tpu.memory_space<vmem>>, %arg2: memref<8x128xf32, #tpu.memory_space<vmem>>, %arg3: memref<8x4xf32, #tpu.memory_space<vmem>>) attributes {dimension_semantics = [], scalar_prefetch = 0 : i64, scratch_operands = 0 : i64, tpu.core_type = #tpu.core_type<tc>} {
    %c0 = arith.constant 0 : index
    %c0_0 = arith.constant 0 : index
    %0 = vector.load %arg0[%c0, %c0_0] : memref<8x8xf32, #tpu.memory_space<vmem>>, vector<8x8xf32>
    %1 = vector.extract_strided_slice %0 {offsets = [0, 0], sizes = [8, 4], strides = [1, 1]} : vector<8x8xf32> to vector<8x4xf32>
    %2 = vector.extract_strided_slice %0 {offsets = [0, 4], sizes = [8, 1], strides = [1, 1]} : vector<8x8xf32> to vector<8x1xf32>
    %3 = vector.extract_strided_slice %0 {offsets = [0, 5], sizes = [8, 1], strides = [1, 1]} : vector<8x8xf32> to vector<8x1xf32>
    %4 = arith.fptosi %3 : vector<8x1xf32> to vector<8x1xi32>
    %c7 = arith.constant 7 : index
    %c0_1 = arith.constant 0 : index
    %5 = vector.load %arg2[%c7, %c0_1] : memref<8x128xf32, #tpu.memory_space<vmem>>, vector<1x4xf32>
    %6 = vector.broadcast %2 : vector<8x1xf32> to vector<8x4xf32>
    %7 = vector.broadcast %5 : vector<1x4xf32> to vector<8x4xf32>
    %8 = arith.mulf %6, %7 : vector<8x4xf32>
    %9 = math.cos %8 : vector<8x4xf32>
    %10 = arith.truncf %9 : vector<8x4xf32> to vector<8x4xbf16>
    %11 = math.sin %8 : vector<8x4xf32>
    %12 = arith.truncf %11 : vector<8x4xf32> to vector<8x4xbf16>
    %13 = tpu.iota {dimensions = array<i32: 1>} : vector<8x16xi32>
    %14 = vector.broadcast %4 : vector<8x1xi32> to vector<8x16xi32>
    %15 = arith.cmpi eq, %13, %14 : vector<8x16xi32>
    %16 = arith.extui %15 : vector<8x16xi1> to vector<8x16xi32>
    %17 = arith.sitofp %16 : vector<8x16xi32> to vector<8x16xf32>
    %18 = arith.truncf %17 : vector<8x16xf32> to vector<8x16xbf16>
    %19 = arith.truncf %1 : vector<8x4xf32> to vector<8x4xbf16>
    %cst = arith.constant 0.000000e+00 : bf16
    %20 = vector.broadcast %cst : bf16 to vector<8x4xbf16>
    %21 = tpu.concatenate %19, %18, %10, %12, %20 in 1 : vector<8x4xbf16>, vector<8x16xbf16>, vector<8x4xbf16>, vector<8x4xbf16>, vector<8x4xbf16> -> vector<8x32xbf16>
    %c0_2 = arith.constant 0 : index
    %c0_3 = arith.constant 0 : index
    %22 = vector.load %arg1[%c0_2, %c0_3] : memref<416x128xbf16, #tpu.memory_space<vmem>>, vector<32x128xbf16>
    %cst_4 = arith.constant dense<0.000000e+00> : vector<8x128xf32>
    %23 = tpu.matmul %21, %22, %cst_4 {dimension_numbers = #tpu.dot_dimension_numbers<[1], [0], [0], [1], [0, 0, 1, 1], [], []>} : vector<8x32xbf16>, vector<32x128xbf16>, vector<8x128xf32> -> vector<8x128xf32>
    %c0_5 = arith.constant 0 : index
    %c0_6 = arith.constant 0 : index
    %24 = vector.load %arg2[%c0_5, %c0_6] : memref<8x128xf32, #tpu.memory_space<vmem>>, vector<1x128xf32>
    %c3 = arith.constant 3 : index
    %c0_7 = arith.constant 0 : index
    %25 = vector.load %arg2[%c3, %c0_7] : memref<8x128xf32, #tpu.memory_space<vmem>>, vector<1x128xf32>
    %cst_8 = arith.constant dense<0.000000e+00> : vector<128xf32>
    %26 = vector.multi_reduction <add>, %23, %cst_8 [0] : vector<8x128xf32> to vector<128xf32>
    %27 = vector.shape_cast %26 : vector<128xf32> to vector<1x128xf32>
    %cst_9 = arith.constant 8.000000e+00 : f32
    %28 = vector.broadcast %cst_9 : f32 to vector<1x128xf32>
    %29 = arith.divf %27, %28 : vector<1x128xf32>
    %30 = vector.broadcast %29 : vector<1x128xf32> to vector<8x128xf32>
    %31 = arith.subf %23, %30 : vector<8x128xf32>
    %32 = arith.mulf %31, %31 : vector<8x128xf32>
    %cst_10 = arith.constant dense<0.000000e+00> : vector<128xf32>
    %33 = vector.multi_reduction <add>, %32, %cst_10 [0] : vector<8x128xf32> to vector<128xf32>
    %34 = vector.shape_cast %33 : vector<128xf32> to vector<1x128xf32>
    %cst_11 = arith.constant 8.000000e+00 : f32
    %35 = vector.broadcast %cst_11 : f32 to vector<1x128xf32>
    %36 = arith.divf %34, %35 : vector<1x128xf32>
    %cst_12 = arith.constant 9.99999974E-6 : f32
    %37 = vector.broadcast %cst_12 : f32 to vector<1x128xf32>
    %38 = arith.addf %36, %37 : vector<1x128xf32>
    %39 = math.rsqrt %38 : vector<1x128xf32>
    %40 = arith.mulf %24, %39 : vector<1x128xf32>
    %41 = vector.broadcast %40 : vector<1x128xf32> to vector<8x128xf32>
    %42 = arith.mulf %31, %41 : vector<8x128xf32>
    %43 = vector.broadcast %25 : vector<1x128xf32> to vector<8x128xf32>
    %44 = arith.addf %42, %43 : vector<8x128xf32>
    %cst_13 = arith.constant 0.000000e+00 : f32
    %45 = vector.broadcast %cst_13 : f32 to vector<8x128xf32>
    %46 = arith.maximumf %44, %45 : vector<8x128xf32>
    %47 = arith.truncf %46 : vector<8x128xf32> to vector<8x128xbf16>
    %c32 = arith.constant 32 : index
    %c0_14 = arith.constant 0 : index
    %48 = vector.load %arg1[%c32, %c0_14] : memref<416x128xbf16, #tpu.memory_space<vmem>>, vector<128x128xbf16>
    %cst_15 = arith.constant dense<0.000000e+00> : vector<8x128xf32>
    %49 = tpu.matmul %47, %48, %cst_15 {dimension_numbers = #tpu.dot_dimension_numbers<[1], [0], [0], [1], [0, 0, 1, 1], [], []>} : vector<8x128xbf16>, vector<128x128xbf16>, vector<8x128xf32> -> vector<8x128xf32>
    %c1 = arith.constant 1 : index
    %c0_16 = arith.constant 0 : index
    %50 = vector.load %arg2[%c1, %c0_16] : memref<8x128xf32, #tpu.memory_space<vmem>>, vector<1x128xf32>
    %c4 = arith.constant 4 : index
    %c0_17 = arith.constant 0 : index
    %51 = vector.load %arg2[%c4, %c0_17] : memref<8x128xf32, #tpu.memory_space<vmem>>, vector<1x128xf32>
    %cst_18 = arith.constant dense<0.000000e+00> : vector<128xf32>
    %52 = vector.multi_reduction <add>, %49, %cst_18 [0] : vector<8x128xf32> to vector<128xf32>
    %53 = vector.shape_cast %52 : vector<128xf32> to vector<1x128xf32>
    %cst_19 = arith.constant 8.000000e+00 : f32
    %54 = vector.broadcast %cst_19 : f32 to vector<1x128xf32>
    %55 = arith.divf %53, %54 : vector<1x128xf32>
    %56 = vector.broadcast %55 : vector<1x128xf32> to vector<8x128xf32>
    %57 = arith.subf %49, %56 : vector<8x128xf32>
    %58 = arith.mulf %57, %57 : vector<8x128xf32>
    %cst_20 = arith.constant dense<0.000000e+00> : vector<128xf32>
    %59 = vector.multi_reduction <add>, %58, %cst_20 [0] : vector<8x128xf32> to vector<128xf32>
    %60 = vector.shape_cast %59 : vector<128xf32> to vector<1x128xf32>
    %cst_21 = arith.constant 8.000000e+00 : f32
    %61 = vector.broadcast %cst_21 : f32 to vector<1x128xf32>
    %62 = arith.divf %60, %61 : vector<1x128xf32>
    %cst_22 = arith.constant 9.99999974E-6 : f32
    %63 = vector.broadcast %cst_22 : f32 to vector<1x128xf32>
    %64 = arith.addf %62, %63 : vector<1x128xf32>
    %65 = math.rsqrt %64 : vector<1x128xf32>
    %66 = arith.mulf %50, %65 : vector<1x128xf32>
    %67 = vector.broadcast %66 : vector<1x128xf32> to vector<8x128xf32>
    %68 = arith.mulf %57, %67 : vector<8x128xf32>
    %69 = vector.broadcast %51 : vector<1x128xf32> to vector<8x128xf32>
    %70 = arith.addf %68, %69 : vector<8x128xf32>
    %cst_23 = arith.constant 0.000000e+00 : f32
    %71 = vector.broadcast %cst_23 : f32 to vector<8x128xf32>
    %72 = arith.maximumf %70, %71 : vector<8x128xf32>
    %73 = arith.truncf %72 : vector<8x128xf32> to vector<8x128xbf16>
    %c160 = arith.constant 160 : index
    %c0_24 = arith.constant 0 : index
    %74 = vector.load %arg1[%c160, %c0_24] : memref<416x128xbf16, #tpu.memory_space<vmem>>, vector<128x128xbf16>
    %cst_25 = arith.constant dense<0.000000e+00> : vector<8x128xf32>
    %75 = tpu.matmul %73, %74, %cst_25 {dimension_numbers = #tpu.dot_dimension_numbers<[1], [0], [0], [1], [0, 0, 1, 1], [], []>} : vector<8x128xbf16>, vector<128x128xbf16>, vector<8x128xf32> -> vector<8x128xf32>
    %c2 = arith.constant 2 : index
    %c0_26 = arith.constant 0 : index
    %76 = vector.load %arg2[%c2, %c0_26] : memref<8x128xf32, #tpu.memory_space<vmem>>, vector<1x128xf32>
    %c5 = arith.constant 5 : index
    %c0_27 = arith.constant 0 : index
    %77 = vector.load %arg2[%c5, %c0_27] : memref<8x128xf32, #tpu.memory_space<vmem>>, vector<1x128xf32>
    %cst_28 = arith.constant dense<0.000000e+00> : vector<128xf32>
    %78 = vector.multi_reduction <add>, %75, %cst_28 [0] : vector<8x128xf32> to vector<128xf32>
    %79 = vector.shape_cast %78 : vector<128xf32> to vector<1x128xf32>
    %cst_29 = arith.constant 8.000000e+00 : f32
    %80 = vector.broadcast %cst_29 : f32 to vector<1x128xf32>
    %81 = arith.divf %79, %80 : vector<1x128xf32>
    %82 = vector.broadcast %81 : vector<1x128xf32> to vector<8x128xf32>
    %83 = arith.subf %75, %82 : vector<8x128xf32>
    %84 = arith.mulf %83, %83 : vector<8x128xf32>
    %cst_30 = arith.constant dense<0.000000e+00> : vector<128xf32>
    %85 = vector.multi_reduction <add>, %84, %cst_30 [0] : vector<8x128xf32> to vector<128xf32>
    %86 = vector.shape_cast %85 : vector<128xf32> to vector<1x128xf32>
    %cst_31 = arith.constant 8.000000e+00 : f32
    %87 = vector.broadcast %cst_31 : f32 to vector<1x128xf32>
    %88 = arith.divf %86, %87 : vector<1x128xf32>
    %cst_32 = arith.constant 9.99999974E-6 : f32
    %89 = vector.broadcast %cst_32 : f32 to vector<1x128xf32>
    %90 = arith.addf %88, %89 : vector<1x128xf32>
    %91 = math.rsqrt %90 : vector<1x128xf32>
    %92 = arith.mulf %76, %91 : vector<1x128xf32>
    %93 = vector.broadcast %92 : vector<1x128xf32> to vector<8x128xf32>
    %94 = arith.mulf %83, %93 : vector<8x128xf32>
    %95 = vector.broadcast %77 : vector<1x128xf32> to vector<8x128xf32>
    %96 = arith.addf %94, %95 : vector<8x128xf32>
    %cst_33 = arith.constant 0.000000e+00 : f32
    %97 = vector.broadcast %cst_33 : f32 to vector<8x128xf32>
    %98 = arith.maximumf %96, %97 : vector<8x128xf32>
    %99 = arith.truncf %98 : vector<8x128xf32> to vector<8x128xbf16>
    %c288 = arith.constant 288 : index
    %c0_34 = arith.constant 0 : index
    %100 = vector.load %arg1[%c288, %c0_34] : memref<416x128xbf16, #tpu.memory_space<vmem>>, vector<128x128xbf16>
    %cst_35 = arith.constant dense<0.000000e+00> : vector<8x128xf32>
    %101 = tpu.matmul %99, %100, %cst_35 {dimension_numbers = #tpu.dot_dimension_numbers<[1], [0], [0], [1], [0, 0, 1, 1], [], []>} : vector<8x128xbf16>, vector<128x128xbf16>, vector<8x128xf32> -> vector<8x128xf32>
    %102 = vector.extract_strided_slice %101 {offsets = [0, 0], sizes = [8, 4], strides = [1, 1]} : vector<8x128xf32> to vector<8x4xf32>
    %c6 = arith.constant 6 : index
    %c0_36 = arith.constant 0 : index
    %103 = vector.load %arg2[%c6, %c0_36] : memref<8x128xf32, #tpu.memory_space<vmem>>, vector<1x4xf32>
    %104 = vector.broadcast %103 : vector<1x4xf32> to vector<8x4xf32>
    %105 = arith.addf %102, %104 : vector<8x4xf32>
    %c0_37 = arith.constant 0 : index
    %c0_38 = arith.constant 0 : index
    %106 = vector.load %arg3[%c0_37, %c0_38] : memref<8x4xf32, #tpu.memory_space<vmem>>, vector<8x4xf32>
    tpu.vector_store %arg3[%c0_37, %c0_38], %105 {strides = array<i32>} : memref<8x4xf32, #tpu.memory_space<vmem>>, vector<8x4xf32>,
    return
  }
}

</mosaic_0001>

<bundles_post_ra>
// kernel: deep_mlp_apply.1
= control target key start
LH: loop header
LB: loop body
LE: loop exit
PB: predicated region body
PF: predicated region fallthrough
CT: control target
= control target key end

     0   :  { %8 = vsyncpa [#allocation3], 0  ;;  %s986_s12 = smov [#allocation2]   ;;  %s1127_s0 = inlined_call_operand.vmem [shape: f32[8,8], index: 0, kind: input, shape index: {}]   ;;  %s1128_s1 = inlined_call_operand.hbm [shape: bf16[416,128], index: 1, kind: input, shape index: {}]   ;;  %s1129_s2 = inlined_call_operand.vmem [shape: f32[8,128], index: 2, kind: input, shape index: {}]   ;;  %s1130_s3 = inlined_call_operand.vmem [shape: f32[8,4], index: 3, kind: output, shape index: {}]  }
   0x1   :  { %s16_s13 = sshll.u32 %s986_s12, 4  ;;  %s17_s13 = int_to_ptr.vmem [resolvable:$true] %s16_s13 }
   0x2   :  { %s972_s14 = scalar_lea.vmem %s17_s13, 3328  ;;  %p977_p1 = scmp.lt.s32.totalorder %s17_s13, %s17_s13 }
   0x3   :  { %p973_p0 = scmp.ne.s32.totalorder %s17_s13, %s972_s14  ;;  %p978_p2 = scmp.lt.s32.totalorder %s972_s14, %s972_s14 }
   0x5   :  { %p979_p3 = por %p978_p2, %p977_p1 }
   0x7   :  { %p980_p4 = pnand %p979_p3, %p973_p0 }
   0x9   :  { %983 = shalt.err (!%p980_p4)
}
   0xa   :  { %s987_s15 = smov 64   ;;  %s988_s16 = smov 4  }
   0xb   :  { %22 = dma.hbm_to_vmem [thread:$0]  %s1128_s1, 3328, %s17_s13, [#allocation3], %s987_s15, %s987_s15, %s988_s16  }
   0xc   :  { %984 = dma.done.wait [#allocation3], 3328  }
   0xd   :  { %985 = vsyncadd [#allocation3], 4294963968  ;;  %v989_v0 = vmov 4   ;;  %v1028_v1 = vld [vmem:[%s1127_s0] sm:$0xff]  ;;  %v990_v4 = vmov 5   ;;  %v991_v5 = vmov 0.0   ;;  %v251_v8 = vlaneseq }
   0xe   :  { %926 = vset.pattern.permute.xlu0 %v989_v0  ;;  %v905_v2 = vtrunc.f32 %v1028_v1  ;;  %837 = vmatprep.subr.bf16.mxu0 %v991_v5  ;;  %v928_v6 = vld [vmem:[#allocation2 + $0x8] sm:$0xff]   ;;  %v766_v7 = vld [vmem:[%s1129_s2 + $0x7] ss:$0 sm:$0xff]  ;;  %v992_v25 = vmov 683565275   ;;  %vm998_vm12 = vmmov 0  }
   0xf   :  { %34 = vperm.xlu0 %926, %v1028_v1   ;;  %845 = vmatprep.subr.bf16.mxu1 %v991_v5  ;;  %v252_v11 = vand.u32 127, %v251_v8  ;;  %v993_v27 = vmov 2475754826   ;;  %v994_v30 = vmov 2131351028   ;;  %s999_s0 = smov 20  }
  0x10   :  { %v906_v3 = vcvt.f32.s32 %v905_v2  ;;  %838 = vmatpush3.bf16.msra.mxu0 %v928_v6  ;;  %v995_v33 = vmov 2102212464   ;;  %v996_v36 = vmov 920167782   ;;  %v997_v39 = vmov 1326507024   ;;  %841 = vmatprep.mubr.msk.bf16.mxu0 %vm998_vm12, %v991_v5 }
  0x11   :  { %839 = vmatprep.subr.bf16.mxu0 %v991_v5  ;;  %861 = vmatprep.mubr.msk.bf16.mxu1 %vm998_vm12, %v991_v5  ;;  %s1000_s22 = smov 24  }
  0x13   :  { %927 = vset.pattern.permute.xlu0 %v990_v4 }
  0x14   :  { %254 = vperm.xlu0 %927, %v906_v3  }
  0x8a   :  { %v35_v9 = vpop.permute.xlu0 %34 }
  0x8b   :  { %v1038_v10 = vmul.f32 %v766_v7, %v35_v9 }
  0x8d   :  { %v45_v12 = vand.u32 2139095040, %v1038_v10  ;;  %v42_v19 = vand.u32 2147483647, %v1038_v10  ;;  %vm44_vm8 = vcmp.lt.s32.totalorder %v1038_v10, 0 }
  0x8f   :  { %v46_v13 = vshrl.u32 %v45_v12, 23  ;;  %v255_v14 = vpop.permute.xlu0 %254  ;;  %v49_v22 = vand.u32 8388607, %v42_v19  ;;  %vm43_vm9 = vcmp.le.f32.partialorder %v42_v19, 0.7853982 }
  0x90   :  { %vm256_vm0 = vcmp.eq.s32.totalorder %v252_v11, %v255_v14 }
  0x91   :  { %v767_v15 = vadd.s32 4294967169, %v46_v13  ;;  %v775_v16 = vsel %vm256_vm0, 1.0, %v991_v5  ;;  %v50_v41 = vor.u32 8388608, %v49_v22 }
  0x92   :  { %v259_v17 = vpack.c.bf16 %v775_v16, %v775_v16 }
  0x93   :  { %v52_v18 = vadd.s32 1, %v767_v15  ;;  %v90_v55 = vshll.u32 %v50_v41, 8 }
  0x94   :  { %262 = vrot.lane.b32.xlu1 %v259_v17, %s988_s16 }
  0x95   :  { %vm53_vm1 = vcmp.gt.s32.totalorder %v52_v18, 0 }
  0x96   :  { %v54_v20 = vsel %vm53_vm1, %v52_v18, 0  ;;  %vm134_vm1 = vweird.f32 %v1038_v10 }
  0x97   :  { %v56_v21 = vand.u32 31, %v54_v20  ;;  %v55_v24 = vshrl.u32 %v54_v20, 5 }
  0x99   :  { %v57_v23 = vsub.s32 32, %v56_v21  ;;  %v59_v26 = vshll.u32 %v992_v25, %v56_v21  ;;  %v62_v28 = vshll.u32 %v993_v27, %v56_v21  ;;  %v65_v32 = vshll.u32 %v994_v30, %v56_v21 }
  0x9a   :  { %v68_v35 = vshll.u32 %v995_v33, %v56_v21  ;;  %v71_v38 = vshll.u32 %v996_v36, %v56_v21  ;;  %vm74_vm2 = vcmp.lt.s32.totalorder %v55_v24, 1  ;;  %vm77_vm3 = vcmp.lt.s32.totalorder %v55_v24, 4 }
  0x9b   :  { %v60_v29 = vshrl.u32 %v993_v27, %v57_v23  ;;  %v63_v31 = vshrl.u32 %v994_v30, %v57_v23  ;;  %v66_v34 = vshrl.u32 %v995_v33, %v57_v23  ;;  %v69_v37 = vshrl.u32 %v996_v36, %v57_v23 }
  0x9c   :  { %v72_v40 = vshrl.u32 %v997_v39, %v57_v23  ;;  %v58_v50 = vshrl.u32 %v992_v25, %v57_v23  ;;  %vm76_vm4 = vcmp.lt.s32.totalorder %v55_v24, 3  ;;  %vm75_vm5 = vcmp.lt.s32.totalorder %v55_v24, 2 }
  0x9d   :  { %v61_v42 = vor.u32 %v60_v29, %v59_v26  ;;  %v64_v43 = vor.u32 %v63_v31, %v62_v28  ;;  %v67_v44 = vor.u32 %v66_v34, %v65_v32  ;;  %v70_v45 = vor.u32 %v69_v37, %v68_v35 }
  0x9e   :  { %v73_v46 = vor.u32 %v72_v40, %v71_v38  ;;  %v929_v38 = vld [vmem:[#allocation2] sm:$0xff]  }
  0x9f   :  { %v79_v47 = vsel %vm77_vm3, %v67_v44, 2102212464  ;;  %v82_v48 = vsel %vm74_vm2, %v61_v42, %v64_v43  ;;  %v86_v49 = vsel %vm74_vm2, %v64_v43, %v67_v44  ;;  %v83_v51 = vsel %vm77_vm3, %v70_v45, 920167782  ;;  %840 = vmatpush3.bf16.msra.mxu0 %v929_v38 }
  0xa0   :  { %v87_v52 = vsel %vm77_vm3, %v73_v46, 1326507024  ;;  %v84_v53 = vsel %vm76_vm4, %v67_v44, %v83_v51  ;;  %v78_v56 = vsel %vm74_vm2, %v58_v50, %v61_v42  ;;  %v80_v57 = vsel %vm76_vm4, %v64_v43, %v79_v47  ;;  %865 = vmatprep.subr.bf16.mxu0 %v991_v5 }
  0xa1   :  { %v88_v54 = vsel %vm76_vm4, %v70_v45, %v87_v52  ;;  %v85_v58 = vsel %vm75_vm5, %v82_v48, %v84_v53  ;;  %v81_v0 = vsel %vm75_vm5, %v78_v56, %v80_v57  ;;  %vm270_vm2 = vcmask 31744  }
  0xa2   :  { %v89_v59 = vsel %vm75_vm5, %v86_v49, %v88_v54  ;;  %v1050_v62 = vmul.u32.u64.low %v90_v55, %v85_v58  ;;  %v1051_v63 = vmul.u32.u64.high %v90_v55, %v85_v58, %v1050_v62  ;;  %v97_v3 = vmul.u32 %v90_v55, %v81_v0  ;;  %v934_v0 = vld [vmem:[#allocation2 + $0x28] sm:$0xff]  }
  0xa3   :  { %v1047_v60 = vmul.u32.u64.low %v90_v55, %v89_v59  ;;  %v1048_v61 = vmul.u32.u64.high %v90_v55, %v89_v59, %v1047_v60  ;;  %v260_v55 = vpack.c.bf16 %v1028_v1, %v1028_v1  ;;  %vm274_vm3 = vcmask 162816   ;;  %v931_v1 = vld [vmem:[#allocation2 + $0x40] sm:$0xff]  }
  0xa4   :  { %v100_v2 = vadd.s32 1, %v1051_v63  ;;  %vm277_vm4 = vcmask 195584   ;;  %vm280_vm5 = vcmask 228352  }
  0xa5   :  { %vm99_vm6 = vc.u32 %v1048_v61, %v1050_v62  ;;  %v98_v18 = vadd.s32 %v1050_v62, %v1048_v61  ;;  %v930_v61 = vld [vmem:[#allocation2 + $0x48] sm:$0xff]   ;;  %v932_v62 = vld [vmem:[#allocation2 + $0x38] sm:$0xff]  }
  0xa6   :  { %v101_v4 = vsel %vm99_vm6, %v100_v2, %v1051_v63  ;;  %vm299_vm6 = vcmask 261120   ;;  %846 = vmatpush3.bf16.msra.mxu1 %v930_v61  ;;  %v933_v63 = vld [vmem:[#allocation2 + $0x30] sm:$0xff]   ;;  %v935_v2 = vld [vmem:[#allocation2 + $0x20] sm:$0xff]  }
  0xa7   :  { %v102_v6 = vadd.s32 %v101_v4, %v97_v3  ;;  %847 = vmatprep.subr.bf16.mxu1 %v991_v5  ;;  %v936_v3 = vld [vmem:[#allocation2 + $0x18] sm:$0xff]   ;;  %v937_v4 = vld [vmem:[#allocation2 + $0x10] sm:$0xff]  }
  0xa9   :  { %v103_v7 = vadd.s32 536870912, %v102_v6 }
  0xaa   :  { %848 = vmatpush3.bf16.msra.mxu1 %v931_v1 }
  0xab   :  { %v104_v9 = vshrl.u32 %v103_v7, 30  ;;  %849 = vmatprep.subr.bf16.mxu1 %v991_v5 }
  0xad   :  { %v105_v11 = vshll.u32 %v104_v9, 30  ;;  %v128_v32 = vsub.s32 4, %v104_v9 }
  0xae   :  { %850 = vmatpush3.bf16.msra.mxu1 %v932_v62 }
  0xaf   :  { %v106_v12 = vsub.s32 %v102_v6, %v105_v11  ;;  %v129_v35 = vsel %vm44_vm8, %v128_v32, %v104_v9  ;;  %851 = vmatprep.subr.bf16.mxu1 %v991_v5 }
  0xb0   :  { %v131_v36 = vsel %vm43_vm9, 0, %v129_v35 }
  0xb1   :  { %v108_v13 = vsub.s32 0, %v106_v12  ;;  %v239_v37 = vadd.s32 3, %v131_v36  ;;  %v135_v39 = vand.u32 3, %v131_v36  ;;  %v779_v36 = vld [vmem:[%s1129_s2 + $0x3] ss:$0 sm:$0xff] }
  0xb2   :  { %852 = vmatpush3.bf16.msra.mxu1 %v933_v63 }
  0xb3   :  { %v768_v14 = vmin.u32 %v108_v13, %v106_v12  ;;  %v240_v40 = vand.u32 3, %v239_v37  ;;  %vm140_vm10 = vcmp.eq.s32.totalorder %v135_v39, 2  ;;  %vm137_vm13 = vcmp.eq.s32.totalorder %v135_v39, 0  ;;  %853 = vmatprep.subr.bf16.mxu1 %v991_v5 }
  0xb4   :  { %vm136_vm15 = vcmp.lt.s32.totalorder %v135_v39, 2 }
  0xb5   :  { %v110_v15 = vclz %v768_v14  ;;  %vm245_vm11 = vcmp.eq.s32.totalorder %v240_v40, 2  ;;  %vm242_vm14 = vcmp.eq.s32.totalorder %v240_v40, 0  ;;  %vm241_vm0 = vcmp.lt.s32.totalorder %v240_v40, 2 }
  0xb6   :  { %854 = vmatpush3.bf16.msra.mxu1 %v934_v0 }
  0xb7   :  { %v769_v16 = vadd.s32 4294967294, %v110_v15  ;;  %855 = vmatprep.subr.bf16.mxu1 %v991_v5 }
  0xb9   :  { %vm770_vm7 = vcmp.lt.s32.totalorder %v769_v16, 0 }
  0xba   :  { %v113_v17 = vsel %vm770_vm7, 0, %v769_v16  ;;  %856 = vmatpush3.bf16.msra.mxu1 %v935_v2 }
  0xbb   :  { %v114_v20 = vsub.s32 32, %v113_v17  ;;  %v118_v21 = vsub.s32 4294967266, %v113_v17  ;;  %v115_v22 = vshll.u32 %v106_v12, %v113_v17  ;;  %857 = vmatprep.subr.bf16.mxu1 %v991_v5 }
  0xbd   :  { %v116_v23 = vshrl.u32 %v98_v18, %v114_v20  ;;  %v119_v24 = vadd.s32 127, %v118_v21 }
  0xbe   :  { %858 = vmatpush3.bf16.msra.mxu1 %v936_v3  ;;  %v480_v3 = vld [vmem:[%s1129_s2 + $0x1] sm:$0x1] }
  0xbf   :  { %v117_v25 = vor.u32 %v116_v23, %v115_v22  ;;  %v120_v26 = vshll.u32 %v119_v24, 23  ;;  %859 = vmatprep.subr.bf16.mxu1 %v991_v5 }
  0xc1   :  { %v121_v27 = vor.u32 4788187, %v120_v26  ;;  %v124_v29 = vcvt.s32.f32 %v117_v25 }
  0xc2   :  { %860 = vmatpush3.bf16.msra.mxu1 %v937_v4 }
  0xc3   :  { %v122_v28 = vand.u32 2147483647, %v121_v27  ;;  %885 = vmatprep.subr.bf16.mxu1 %v991_v5 }
  0xc5   :  { %v125_v30 = vmul.f32 %v124_v29, %v122_v28 }
  0xc7   :  { %v126_v31 = vxor.u32 2147483648, %v125_v30 }
  0xc9   :  { %v127_v33 = vsel %vm44_vm8, %v126_v31, %v125_v30  ;;  %v365_v30 = vshrl.u32 %v251_v8, 7  ;;  %v342_v31 = vld [vmem:[%s1129_s2] sm:$0x1]  ;;  %v938_v8 = vld [vmem:[#allocation2 + $0x88] sm:$0xff]  }
  0xca   :  { %v130_v34 = vsel %vm43_vm9, %v1038_v10, %v127_v33 }
  0xcb   :  { %954 = vcosq.f32 %v130_v34  ;;  %v1084_v32 = vsub.s32 0, %v365_v30 }
  0xcc   :  { %956 = vsinq.f32 %v130_v34 }
  0xd8   :  { %v955_v41 = vpop.eup %954 }
  0xd9   :  { %v957_v42 = vpop.eup %956  ;;  %v141_v43 = vxor.u32 2147483648, %v955_v41 }
  0xda   :  { %v138_v44 = vxor.u32 2147483648, %v957_v42 }
  0xdb   :  { %v142_v19 = vsel %vm140_vm10, %v141_v43, %v957_v42  ;;  %v247_v45 = vsel %vm245_vm11, %v141_v43, %v957_v42  ;;  %v940_v42 = vld [vmem:[#allocation2 + $0x78] sm:$0xff]   ;;  %v941_v43 = vld [vmem:[#allocation2 + $0x70] sm:$0xff]  }
  0xdc   :  { %v139_v46 = vsel %vm137_vm13, %v955_v41, %v138_v44  ;;  %v244_v47 = vsel %vm242_vm14, %v955_v41, %v138_v44  ;;  %v939_v41 = vld [vmem:[#allocation2 + $0x80] sm:$0xff]   ;;  %v942_v44 = vld [vmem:[#allocation2 + $0x68] sm:$0xff]  }
  0xdd   :  { %v143_v48 = vsel %vm136_vm15, %v139_v46, %v142_v19  ;;  %v248_v49 = vsel %vm241_vm0, %v244_v47, %v247_v45  ;;  %v943_v19 = vld [vmem:[#allocation2 + $0x60] sm:$0xff]   ;;  %v944_v45 = vld [vmem:[#allocation2 + $0x58] sm:$0xff]   ;;  %v945_v46 = vld [vmem:[#allocation2 + $0x50] sm:$0xff]  }
  0xde   :  { %v144_v50 = vsel %vm134_vm1, nan, %v143_v48  ;;  %v249_v52 = vsel %vm134_vm1, nan, %v248_v49 }
  0xdf   :  { %v145_v51 = vpack.c.bf16 %v144_v50, %v144_v50  ;;  %v250_v53 = vpack.c.bf16 %v249_v52, %v249_v52 }
  0xe1   :  { %265 = vrot.lane.b32.xlu1 %v145_v51, %s999_s0 }
  0xe5   :  { %268 = vrot.lane.b32.xlu1 %v250_v53, %s1000_s22 }
 0x106   :  { %v263_v54 = vpop.permute.xlu1 %262 }
 0x107   :  { %v273_v10 = vsel %vm270_vm2, %v260_v55, %v263_v54 }
 0x153   :  { %v266_v56 = vpop.permute.xlu1 %265 }
 0x154   :  { %v276_v57 = vsel %vm274_vm3, %v273_v10, %v266_v56 }
 0x157   :  { %v269_v58 = vpop.permute.xlu1 %268 }
 0x158   :  { %v279_v59 = vsel %vm277_vm4, %v276_v57, %v269_v58 }
 0x159   :  { %v282_v60 = vsel %vm280_vm5, %v279_v59, 0 }
 0x15a   :  { %842 = vmatmul.mubr.msk.bf16.vlgmr.msra.gmra.mxu0 %vm299_vm6, %v282_v60 }
 0x15b   :  { %881 = vmatprep.mubr.msk.bf16.mxu0 %vm998_vm12, %v991_v5  ;;  %866 = vmatpush3.bf16.msra.mxu0 %v938_v8 }
 0x15c   :  { %867 = vmatprep.subr.bf16.mxu0 %v991_v5 }
 0x15f   :  { %868 = vmatpush3.bf16.msra.mxu0 %v939_v41 }
 0x160   :  { %869 = vmatprep.subr.bf16.mxu0 %v991_v5 }
 0x163   :  { %870 = vmatpush3.bf16.msra.mxu0 %v940_v42 }
 0x164   :  { %871 = vmatprep.subr.bf16.mxu0 %v991_v5 }
 0x167   :  { %872 = vmatpush3.bf16.msra.mxu0 %v941_v43 }
 0x168   :  { %873 = vmatprep.subr.bf16.mxu0 %v991_v5 }
 0x16b   :  { %874 = vmatpush3.bf16.msra.mxu0 %v942_v44  ;;  %v617_v44 = vld [vmem:[%s1129_s2 + $0x2] sm:$0x1] }
 0x16c   :  { %875 = vmatprep.subr.bf16.mxu0 %v991_v5 }
 0x16f   :  { %876 = vmatpush3.bf16.msra.mxu0 %v943_v19 }
 0x170   :  { %877 = vmatprep.subr.bf16.mxu0 %v991_v5 }
 0x173   :  { %878 = vmatpush3.bf16.msra.mxu0 %v944_v45 }
 0x174   :  { %879 = vmatprep.subr.bf16.mxu0 %v991_v5 }
 0x177   :  { %880 = vmatpush3.bf16.msra.mxu0 %v945_v46 }
 0x21a   :  { %v336_v6 = vpop.f32.mrf.mxu0 }
 0x21b   :  { %v344_v7 = vrot.slane %v336_v6, 4 }
 0x21c   :  { %v843_v9 = vpop.f32.mrf.mxu0 }
 0x21d   :  { %v345_v11 = vadd.f32 %v344_v7, %v336_v6  ;;  %v788_v9 = vld [vmem:[%s1129_s2 + $0x4] ss:$0 sm:$0xff] }
 0x21e   :  { %v339_v12 = vpop.f32.mrf.mxu0 }
 0x21f   :  { %v346_v13 = vrot.slane %v345_v11, 2 }
 0x220   :  { %v844_v14 = vpop.f32.mrf.mxu0 }
 0x221   :  { %v347_v15 = vadd.f32 %v346_v13, %v345_v11 }
 0x223   :  { %v348_v16 = vrot.slane %v347_v15, 1 }
 0x225   :  { %v349_v17 = vadd.f32 %v348_v16, %v347_v15  ;;  %v946_v15 = vld [vmem:[#allocation2 + $0xc8] sm:$0xff]   ;;  %v947_v16 = vld [vmem:[#allocation2 + $0xc0] sm:$0xff]  }
 0x227   :  { %v351_v18 = vmul.f32 0.125, %v349_v17  ;;  %v948_v17 = vld [vmem:[#allocation2 + $0xb8] sm:$0xff]  }
 0x229   :  { %v352_v20 = vsub.f32 %v336_v6, %v351_v18  ;;  %v949_v18 = vld [vmem:[#allocation2 + $0xb0] sm:$0xff]  }
 0x22b   :  { %v353_v21 = vmul.f32 %v352_v20, %v352_v20 }
 0x22d   :  { %v354_v22 = vrot.slane %v353_v21, 4 }
 0x22f   :  { %v355_v23 = vadd.f32 %v354_v22, %v353_v21  ;;  %v951_v21 = vld [vmem:[#allocation2 + $0xa0] sm:$0xff]   ;;  %v952_v22 = vld [vmem:[#allocation2 + $0x98] sm:$0xff]  }
 0x231   :  { %v356_v24 = vrot.slane %v355_v23, 2 }
 0x233   :  { %v357_v25 = vadd.f32 %v356_v24, %v355_v23  ;;  %v953_v23 = vld [vmem:[#allocation2 + $0x90] sm:$0xff]  }
 0x235   :  { %v358_v26 = vrot.slane %v357_v25, 1 }
 0x237   :  { %v359_v27 = vadd.f32 %v358_v26, %v357_v25 }
 0x239   :  { %v360_v28 = vmul.f32 0.125, %v359_v27 }
 0x23b   :  { %v361_v29 = vadd.f32 1e-05, %v360_v28 }
 0x23d   :  { %958 = vrsqrt.f32 %v361_v29 }
 0x24a   :  { %v959_v33 = vpop.eup %958 }
 0x24b   :  { %v363_v34 = vmul.f32 %v959_v33, %v342_v31 }
 0x24d   :  { %v367_v35 = vrot.slane %v363_v34, %v1084_v32 }
 0x24f   :  { %v368_v37 = vmul.f32 %v367_v35, %v352_v20  ;;  %v950_v20 = vld [vmem:[#allocation2 + $0xa8] sm:$0xff]  }
 0x251   :  { %v373_v38 = vadd.f32 %v779_v36, %v368_v37 }
 0x253   :  { %v374_v39 = vmax.f32 %v373_v38, 0.0 }
 0x255   :  { %v375_v40 = vpack.c.bf16 %v374_v39, %v374_v39 }
 0x257   :  { %862 = vmatmul.mubr.bf16.vlgmr.msra.gmra.mxu1 %v375_v40 }
 0x258   :  { %901 = vmatprep.mubr.msk.bf16.mxu1 %vm998_vm12, %v991_v5  ;;  %886 = vmatpush3.bf16.msra.mxu1 %v946_v15 }
 0x259   :  { %887 = vmatprep.subr.bf16.mxu1 %v991_v5 }
 0x25c   :  { %888 = vmatpush3.bf16.msra.mxu1 %v947_v16 }
 0x25d   :  { %889 = vmatprep.subr.bf16.mxu1 %v991_v5 }
 0x260   :  { %890 = vmatpush3.bf16.msra.mxu1 %v948_v17 }
 0x261   :  { %891 = vmatprep.subr.bf16.mxu1 %v991_v5 }
 0x264   :  { %892 = vmatpush3.bf16.msra.mxu1 %v949_v18 }
 0x265   :  { %893 = vmatprep.subr.bf16.mxu1 %v991_v5 }
 0x268   :  { %894 = vmatpush3.bf16.msra.mxu1 %v950_v20 }
 0x269   :  { %895 = vmatprep.subr.bf16.mxu1 %v991_v5 }
 0x26c   :  { %896 = vmatpush3.bf16.msra.mxu1 %v951_v21 }
 0x26d   :  { %897 = vmatprep.subr.bf16.mxu1 %v991_v5 }
 0x270   :  { %898 = vmatpush3.bf16.msra.mxu1 %v952_v22 }
 0x271   :  { %899 = vmatprep.subr.bf16.mxu1 %v991_v5 }
 0x274   :  { %900 = vmatpush3.bf16.msra.mxu1 %v953_v23 }
 0x317   :  { %v474_v47 = vpop.f32.mrf.mxu1 }
 0x318   :  { %v482_v48 = vrot.slane %v474_v47, 4 }
 0x319   :  { %v863_v49 = vpop.f32.mrf.mxu1 }
 0x31a   :  { %v483_v50 = vadd.f32 %v482_v48, %v474_v47 }
 0x31b   :  { %v477_v51 = vpop.f32.mrf.mxu1 }
 0x31c   :  { %v484_v52 = vrot.slane %v483_v50, 2 }
 0x31d   :  { %v864_v53 = vpop.f32.mrf.mxu1 }
 0x31e   :  { %v485_v54 = vadd.f32 %v484_v52, %v483_v50  ;;  %v806_v52 = vld [vmem:[%s1129_s2 + $0x6] ss:$0 sm:$0xff] }
 0x320   :  { %v486_v55 = vrot.slane %v485_v54, 1 }
 0x322   :  { %v487_v56 = vadd.f32 %v486_v55, %v485_v54 }
 0x324   :  { %v488_v10 = vmul.f32 0.125, %v487_v56 }
 0x326   :  { %v489_v57 = vsub.f32 %v474_v47, %v488_v10  ;;  %v797_v47 = vld [vmem:[%s1129_s2 + $0x5] ss:$0 sm:$0xff] }
 0x328   :  { %v490_v58 = vmul.f32 %v489_v57, %v489_v57 }
 0x32a   :  { %v491_v59 = vrot.slane %v490_v58, 4 }
 0x32c   :  { %v492_v60 = vadd.f32 %v491_v59, %v490_v58 }
 0x32e   :  { %v493_v61 = vrot.slane %v492_v60, 2 }
 0x330   :  { %v494_v1 = vadd.f32 %v493_v61, %v492_v60 }
 0x332   :  { %v495_v62 = vrot.slane %v494_v1, 1 }
 0x334   :  { %v496_v63 = vadd.f32 %v495_v62, %v494_v1 }
 0x336   :  { %v497_v0 = vmul.f32 0.125, %v496_v63 }
 0x338   :  { %v498_v2 = vadd.f32 1e-05, %v497_v0 }
 0x33a   :  { %960 = vrsqrt.f32 %v498_v2 }
 0x347   :  { %v961_v4 = vpop.eup %960 }
 0x348   :  { %v500_v6 = vmul.f32 %v961_v4, %v480_v3 }
 0x34a   :  { %v504_v7 = vrot.slane %v500_v6, %v1084_v32 }
 0x34c   :  { %v505_v11 = vmul.f32 %v504_v7, %v489_v57 }
 0x34e   :  { %v510_v12 = vadd.f32 %v788_v9, %v505_v11 }
 0x350   :  { %v511_v13 = vmax.f32 %v510_v12, 0.0 }
 0x352   :  { %v512_v14 = vpack.c.bf16 %v511_v13, %v511_v13 }
 0x354   :  { %882 = vmatmul.mubr.bf16.vlgmr.msra.gmra.mxu0 %v512_v14 }
 0x414   :  { %v611_v24 = vpop.f32.mrf.mxu0 }
 0x415   :  { %v619_v25 = vrot.slane %v611_v24, 4 }
 0x416   :  { %v883_v26 = vpop.f32.mrf.mxu0 }
 0x417   :  { %v620_v27 = vadd.f32 %v619_v25, %v611_v24 }
 0x418   :  { %v614_v28 = vpop.f32.mrf.mxu0 }
 0x419   :  { %v621_v29 = vrot.slane %v620_v27, 2 }
 0x41a   :  { %v884_v30 = vpop.f32.mrf.mxu0 }
 0x41b   :  { %v622_v31 = vadd.f32 %v621_v29, %v620_v27 }
 0x41d   :  { %v623_v33 = vrot.slane %v622_v31, 1 }
 0x41f   :  { %v624_v34 = vadd.f32 %v623_v33, %v622_v31 }
 0x421   :  { %v625_v35 = vmul.f32 0.125, %v624_v34 }
 0x423   :  { %v626_v36 = vsub.f32 %v611_v24, %v625_v35 }
 0x425   :  { %v627_v37 = vmul.f32 %v626_v36, %v626_v36 }
 0x427   :  { %v628_v38 = vrot.slane %v627_v37, 4 }
 0x429   :  { %v629_v39 = vadd.f32 %v628_v38, %v627_v37 }
 0x42b   :  { %v630_v40 = vrot.slane %v629_v39, 2 }
 0x42d   :  { %v631_v8 = vadd.f32 %v630_v40, %v629_v39 }
 0x42f   :  { %v632_v41 = vrot.slane %v631_v8, 1 }
 0x431   :  { %v633_v5 = vadd.f32 %v632_v41, %v631_v8 }
 0x433   :  { %v634_v42 = vmul.f32 0.125, %v633_v5 }
 0x435   :  { %v635_v43 = vadd.f32 1e-05, %v634_v42 }
 0x437   :  { %962 = vrsqrt.f32 %v635_v43 }
 0x444   :  { %v963_v19 = vpop.eup %962 }
 0x445   :  { %v637_v45 = vmul.f32 %v963_v19, %v617_v44 }
 0x447   :  { %v641_v46 = vrot.slane %v637_v45, %v1084_v32 }
 0x449   :  { %v642_v48 = vmul.f32 %v641_v46, %v626_v36 }
 0x44b   :  { %v647_v49 = vadd.f32 %v797_v47, %v642_v48 }
 0x44d   :  { %v648_v50 = vmax.f32 %v647_v49, 0.0 }
 0x44f   :  { %v649_v51 = vpack.c.bf16 %v648_v50, %v648_v50 }
 0x451   :  { %902 = vmatmul.mubr.bf16.vlgmr.msra.gmra.mxu1 %v649_v51 }
 0x511   :  { %v748_v53 = vpop.f32.mrf.mxu1 }
 0x512   :  { %v759_v54 = vadd.f32 %v806_v52, %v748_v53 }
 0x513   :  { %v903_v55 = vpop.f32.mrf.mxu1 }
 0x514   :  { %760 = vst.msk [vmem:[%s1130_s3] sm:$0xff] %vm270_vm2, %v759_v54 }
 0x515   :  { %v751_v32 = vpop.f32.mrf.mxu1 }
 0x517   :  { %v904_v56 = vpop.f32.mrf.mxu1 }
 0x518   :  { %765 = vsyncpa [#allocation3], 1 }

</bundles_post_ra>
